<compile_context>
chip_gen: v6e
topology: v6e:2x2x1
jax: 0.10.0
libtpu: 0.0.40
codegen_flags: <defaults>
</compile_context>

<pallas_src>
import functools

import jax
import jax.numpy as jnp
from jax import lax
from jax.experimental import pallas as pl
from jax.experimental.pallas import tpu as pltpu

_MIB = 1024 * 1024
_SMALL_D_MAX = 64          # lane-dense + MXU-selector path for D <= 64


def _round_up(x, m):
    return (x + m - 1) // m * m


def _vmem_cap_bytes():
    """Physical per-core VMEM; conservative fallback = v7x's 64 MiB."""
    try:
        return int(pltpu.get_tpu_info().vmem_capacity_bytes)
    except Exception:
        return 64 * _MIB


def _accum_contrib(acc_ref, contrib, step, *, B, TB, mask_needed, full_steps):
    """Accumulate a (TB, D) contribution, masking rows past the true batch.

    mask_needed / full_steps are Python-static, so when the batch tiles exactly
    there is zero masking overhead, and otherwise the iota/where only runs on
    the trailing (partial / overhang) steps.
    """
    if not mask_needed:
        acc_ref[...] += contrib
        return

    @pl.when(step < full_steps)
    def _full():
        acc_ref[...] += contrib

    @pl.when(step >= full_steps)
    def _partial():
        row = step * TB + lax.broadcasted_iota(jnp.int32, (contrib.shape[0], 1), 0)
        # select (not multiply) so stale/garbage padded rows (possibly NaN/Inf)
        # never reach the accumulator.
        acc_ref[...] += jnp.where(row < B, contrib, 0.0)


def _dura_rescal_small_kernel(h_ref, r_ref, t_ref, exp_h_ref, exp_t_ref,
                              red_h_ref, red_t_ref, out_ref, acc_ref,
                              *, B, TB, G_inner, full_steps, mask_needed):
    """Lane-dense path (D <= 64): r block is (TB, D*D), reductions on the MXU."""
    o = pl.program_id(0)          # outer: "parallel" (megacore split on v7x)
    i = pl.program_id(1)          # inner: sequential accumulation
    step = o * G_inner + i

    @pl.when(i == 0)
    def _init():
        acc_ref[...] = jnp.zeros_like(acc_ref)

    h = h_ref[...].astype(jnp.float32)                       # (TB, D)
    t = t_ref[...].astype(jnp.float32)                       # (TB, D)
    rf = r_ref[...].astype(jnp.float32)                      # (TB, D*D) lane-dense

    # MXU expands into the lane-dense layout (constant 0/1 selectors):
    #   h_tiled[b, i*D+j] = h[b, j]        t_rep[b, j*D+i] = t[b, j]
    h_tiled = jnp.dot(h, exp_h_ref[...], preferred_element_type=jnp.float32)
    # rh[b, i] = sum_j r[b, i, j] * h[b, j]   (MXU reduce of the VPU product)
    rh = jnp.dot(rf * h_tiled, red_h_ref[...], preferred_element_type=jnp.float32)

    t_rep = jnp.dot(t, exp_t_ref[...], preferred_element_type=jnp.float32)
    # rt[b, i] = sum_j r[b, j, i] * t[b, j]
    rt = jnp.dot(rf * t_rep, red_t_ref[...], preferred_element_type=jnp.float32)

    contrib = 2.0 * (h * h + t * t) + rh * rh + rt * rt      # (TB, D)
    _accum_contrib(acc_ref, contrib, step, B=B, TB=TB,
                   mask_needed=mask_needed, full_steps=full_steps)

    @pl.when(i == pl.num_programs(1) - 1)
    def _flush():
        out_ref[0, 0] = jnp.sum(acc_ref[...])


def _dura_rescal_big_kernel(h_ref, r_ref, t_ref, out_ref, acc_ref,
                            *, B, TB, G_inner, full_steps, mask_needed):
    """Fallback path (D > 64): (TB, D, D) blocks, VPU lane/sublane reductions."""
    o = pl.program_id(0)
    i = pl.program_id(1)
    step = o * G_inner + i

    @pl.when(i == 0)
    def _init():
        acc_ref[...] = jnp.zeros_like(acc_ref)

    h3 = h_ref[...].astype(jnp.float32)          # (TB, 1, D)
    t3 = t_ref[...].astype(jnp.float32)          # (TB, 1, D)
    r = r_ref[...].astype(jnp.float32)           # (TB, D, D)
    h = h3[:, 0, :]                              # (TB, D)
    t = t3[:, 0, :]                              # (TB, D)

    # TODO(synk): a single unrolled loop over the middle index could update both
    # rh/rt partials from one pass over r (halves vld pressure on v7x).
    rh = jnp.sum(r * h3, axis=2)                 # bmm(r,   h)   -> (TB, D)
    rt = jnp.sum(r * t[:, :, None], axis=1)      # bmm(r^T, t)   -> (TB, D)

    contrib = 2.0 * (h * h + t * t) + rh * rh + rt * rt
    _accum_contrib(acc_ref, contrib, step, B=B, TB=TB,
                   mask_needed=mask_needed, full_steps=full_steps)

    @pl.when(i == pl.num_programs(1) - 1)
    def _flush():
        out_ref[0, 0] = jnp.sum(acc_ref[...])


def dura_rescal_1(h, r, t, weight: float, *, max_batch_tile=None):
    """h: (B, D), r: (B, D, D), t: (B, D)  ->  scalar f32 = weight * norm / B.

    max_batch_tile optionally caps the auto-chosen batch tile (mainly to
    exercise the multi-tile / partial-tile paths with small inputs).
    """
    B, D = h.shape
    assert r.shape == (B, D, D) and t.shape == (B, D)

    cap = _vmem_cap_bytes()
    limit_cap = int(cap * 0.65)                       # headroom for Mosaic scratch
    # Generation-aware tile-byte target: bigger blocks on 128-MiB-VMEM chips.
    target_tile_bytes = 4 * _MIB if cap >= 100 * _MIB else 2 * _MIB

    small_d = D <= _SMALL_D_MAX

    if small_d:
        # ---------------- lane-dense path ----------------
        DD = D * D
        row_bytes = _round_up(DD, 128) * 4            # padded bytes per r row
        budget_rows = max(8, (target_tile_bytes // row_bytes) // 8 * 8)
        if max_batch_tile is not None:
            budget_rows = min(budget_rows, max(8, max_batch_tile // 8 * 8))
        TB = B if B <= budget_rows else budget_rows   # TB == B or TB % 8 == 0

        const_bytes = (2 * DD * _round_up(D, 128) * 4          # red_h, red_t
                       + 2 * _round_up(D, 8) * _round_up(DD, 128) * 4)  # exp_h, exp_t

        def est(tb):
            r_tile = tb * row_bytes
            ht_tile = _round_up(tb, 8) * _round_up(D, 128) * 4
            acc = _round_up(tb, 8) * _round_up(D, 128) * 4
            temps = 4 * r_tile                        # f32 cast + expands + products
            return 2 * r_tile + 4 * ht_tile + 2 * const_bytes + acc + temps

        while TB > 8 and TB != B and est(TB) * 3 // 2 > limit_cap:
            TB = max(8, (TB // 2) // 8 * 8)
    else:
        # ---------------- (TB, D, D) fallback path ----------------
        lane_d = _round_up(D, 128)
        sub_d = _round_up(D, 8)
        row_bytes = lane_d * sub_d * 4
        budget_rows = max(1, target_tile_bytes // row_bytes)
        if max_batch_tile is not None:
            budget_rows = min(budget_rows, max(1, max_batch_tile))
        TB = min(B, budget_rows)                      # any TB >= 1 is legal here

        def est(tb):
            r_tile = tb * row_bytes
            ht_tile = tb * 8 * lane_d * 4             # (TB,1,D) block, sublane pad
            acc = _round_up(tb, 8) * lane_d * 4
            return 6 * r_tile + 4 * ht_tile + acc     # 2x buffered + ~4 temporaries

        while TB > 1 and est(TB) * 3 // 2 > limit_cap:
            TB = max(1, TB // 2)

    num_steps = -(-B // TB)
    # Always give v7x's two TensorCores an outer "parallel" axis when there are
    # >= 2 tiles; odd tile counts get one clamped+masked overhang step.
    G_outer = 2 if num_steps >= 2 else 1
    G_inner = -(-num_steps // G_outer)
    last_block = num_steps - 1
    mask_needed = (G_outer * G_inner * TB != B)
    full_steps = B // TB

    vmem_limit = max(32 * _MIB, min(limit_cap, est(TB) * 3 // 2))
    compiler_params = pltpu.CompilerParams(
        dimension_semantics=("parallel", "arbitrary"),
        vmem_limit_bytes=int(vmem_limit),
    )

    if small_d:
        DD = D * D
        # Constant 0/1 selector matrices (exact in any dtype):
        #   exp_h (D, DD): h @ exp_h  -> h_tiled[b, i*D+j] = h[b, j]
        #   exp_t (D, DD): t @ exp_t  -> t_rep [b, j*D+i] = t[b, j]
        #   red_h (DD, D): prod @ red_h -> rh[b, i] = sum_j prod[b, i*D+j]
        #   red_t (DD, D): prod @ red_t -> rt[b, i] = sum_j prod[b, j*D+i]
        k = jnp.arange(DD, dtype=jnp.int32)
        ki = k // D
        kj = k % D
        d_idx = jnp.arange(D, dtype=jnp.int32)
        exp_h = (kj[None, :] == d_idx[:, None]).astype(jnp.float32)
        exp_t = (ki[None, :] == d_idx[:, None]).astype(jnp.float32)
        red_h = (ki[:, None] == d_idx[None, :]).astype(jnp.float32)
        red_t = (kj[:, None] == d_idx[None, :]).astype(jnp.float32)

        r_flat = r.reshape(B, DD)                     # free: last two dims contiguous

        kernel = functools.partial(
            _dura_rescal_small_kernel, B=B, TB=TB, G_inner=G_inner,
            full_steps=full_steps, mask_needed=mask_needed)

        idx2 = lambda o, i: (jnp.minimum(o * G_inner + i, last_block), 0)
        idx_const = lambda o, i: (0, 0)               # stays VMEM-resident, no re-DMA

        partials = pl.pallas_call(
            kernel,
            out_shape=jax.ShapeDtypeStruct((G_outer, 1), jnp.float32),
            grid_spec=pltpu.PrefetchScalarGridSpec(
                num_scalar_prefetch=0,
                grid=(G_outer, G_inner),
                in_specs=[
                    pl.BlockSpec((TB, D), idx2),          # h
                    pl.BlockSpec((TB, DD), idx2),         # r (lane-dense)
                    pl.BlockSpec((TB, D), idx2),          # t
                    pl.BlockSpec((D, DD), idx_const),     # exp_h
                    pl.BlockSpec((D, DD), idx_const),     # exp_t
                    pl.BlockSpec((DD, D), idx_const),     # red_h
                    pl.BlockSpec((DD, D), idx_const),     # red_t
                ],
                out_specs=pl.BlockSpec((1, 1), lambda o, i: (o, 0),
                                       memory_space=pltpu.SMEM),
                scratch_shapes=[pltpu.VMEM((TB, D), jnp.float32)],
            ),
            compiler_params=compiler_params,
        )(h, r_flat, t, exp_h, exp_t, red_h, red_t)
    else:
        # h/t reshaped to (B, 1, D): last two block dims always equal the full
        # array dims, so TB can be any value >= 1 (fixes the old TB>=8 floor
        # that blew VMEM for large D).
        h3 = h.reshape(B, 1, D)
        t3 = t.reshape(B, 1, D)

        kernel = functools.partial(
            _dura_rescal_big_kernel, B=B, TB=TB, G_inner=G_inner,
            full_steps=full_steps, mask_needed=mask_needed)

        idx3 = lambda o, i: (jnp.minimum(o * G_inner + i, last_block), 0, 0)

        partials = pl.pallas_call(
            kernel,
            out_shape=jax.ShapeDtypeStruct((G_outer, 1), jnp.float32),
            grid_spec=pltpu.PrefetchScalarGridSpec(
                num_scalar_prefetch=0,
                grid=(G_outer, G_inner),
                in_specs=[
                    pl.BlockSpec((TB, 1, D), idx3),       # h
                    pl.BlockSpec((TB, D, D), idx3),       # r
                    pl.BlockSpec((TB, 1, D), idx3),       # t
                ],
                out_specs=pl.BlockSpec((1, 1), lambda o, i: (o, 0),
                                       memory_space=pltpu.SMEM),
                scratch_shapes=[pltpu.VMEM((TB, D), jnp.float32)],
            ),
            compiler_params=compiler_params,
        )(h3, r, t3)

    norm = jnp.sum(partials)
    return (weight * norm / B).astype(jnp.float32)


def _reference(h, r, t, weight):
    hf = h.astype(jnp.float32)
    tf = t.astype(jnp.float32)
    rf = r.astype(jnp.float32)
    hp = jax.lax.Precision.HIGHEST
    norm = 2.0 * jnp.sum(hf ** 2 + tf ** 2)
    rh = jnp.einsum("bij,bj->bi", rf, hf, precision=hp)
    rt = jnp.einsum("bji,bj->bi", rf, tf, precision=hp)
    norm = norm + jnp.sum(rh ** 2) + jnp.sum(rt ** 2)
    return weight * norm / h.shape[0]


if __name__ == "__main__":
    weight = 0.05
    # (B, D, dtype, max_batch_tile)
    cases = [
        (8, 32, jnp.float32, None),    # literal module-scale shape (batch=8, hidden=32)
        (20, 32, jnp.float32, 8),      # lane-dense path: multi-tile, partial tile + megacore overhang
        (20, 256, jnp.float32, None),  # D>64 fallback path: multi-tile, partial + overhang
        (16, 32, jnp.bfloat16, None),  # bf16 inputs (halved r HBM traffic), f32 accumulation
    ]
    for idx, (B, D, dtype, mbt) in enumerate(cases):
        k1, k2, k3 = jax.random.split(jax.random.fold_in(jax.random.PRNGKey(0), idx), 3)
        h = jax.random.normal(k1, (B, D), dtype=jnp.float32).astype(dtype)
        r = jax.random.normal(k2, (B, D, D), dtype=jnp.float32).astype(dtype)
        t = jax.random.normal(k3, (B, D), dtype=jnp.float32).astype(dtype)

        out = jax.block_until_ready(dura_rescal_1(h, r, t, weight, max_batch_tile=mbt))
        ref = _reference(h, r, t, weight)
        # Tolerance allows for reduced-precision MXU passes in the selector
        # matmuls (reference runs at HIGHEST precision); regularizer-grade.
        assert jnp.allclose(out, ref, rtol=5e-3, atol=1e-3), (B, D, str(dtype), out, ref)

    print("KERNEL_OK")
</pallas_src>

<mosaic_0001>
module attributes {stable_mosaic.version = 11 : i64} {
  func.func @_dura_rescal_small_kernel(%arg0: i32, %arg1: i32, %arg2: memref<8x32xf32, #tpu.memory_space<vmem>>, %arg3: memref<8x1024xf32, #tpu.memory_space<vmem>>, %arg4: memref<8x32xf32, #tpu.memory_space<vmem>>, %arg5: memref<32x1024xf32, #tpu.memory_space<vmem>>, %arg6: memref<32x1024xf32, #tpu.memory_space<vmem>>, %arg7: memref<1024x32xf32, #tpu.memory_space<vmem>>, %arg8: memref<1024x32xf32, #tpu.memory_space<vmem>>, %arg9: memref<1x1xf32, #tpu.memory_space<smem>>, %arg10: memref<8x32xf32, #tpu.memory_space<vmem>>) attributes {dimension_semantics = [#tpu.dimension_semantics<parallel>, #tpu.dimension_semantics<arbitrary>], iteration_bounds = array<i64: 1, 1>, scalar_prefetch = 0 : i64, scratch_operands = 1 : i64, tpu.core_type = #tpu.core_type<tc>, window_params = [{transform_indices = @transform_0, window_bounds = array<i64: 8, 32>}, {transform_indices = @transform_1, window_bounds = array<i64: 8, 1024>}, {transform_indices = @transform_2, window_bounds = array<i64: 8, 32>}, {pipeline_mode = #tpu.pipeline_mode<synchronous>, transform_indices = @transform_3, window_bounds = array<i64: 32, 1024>}, {pipeline_mode = #tpu.pipeline_mode<synchronous>, transform_indices = @transform_4, window_bounds = array<i64: 32, 1024>}, {pipeline_mode = #tpu.pipeline_mode<synchronous>, transform_indices = @transform_5, window_bounds = array<i64: 1024, 32>}, {pipeline_mode = #tpu.pipeline_mode<synchronous>, transform_indices = @transform_6, window_bounds = array<i64: 1024, 32>}, {transform_indices = @transform_7, window_bounds = array<i64: 1, 1>}]} {
    %c0_i32 = arith.constant 0 : i32
    %0 = arith.cmpi eq, %arg1, %c0_i32 : i32
    %1 = arith.extui %0 : i1 to i32
    %c0_i32_0 = arith.constant 0 : i32
    %2 = arith.cmpi ne, %1, %c0_i32_0 : i32
    scf.if %2 {
      %cst_24 = arith.constant 0.000000e+00 : f32
      %31 = vector.broadcast %cst_24 : f32 to vector<8x32xf32>
      %c0_25 = arith.constant 0 : index
      %c0_26 = arith.constant 0 : index
      %32 = vector.load %arg10[%c0_25, %c0_26] : memref<8x32xf32, #tpu.memory_space<vmem>>, vector<8x32xf32>
      tpu.vector_store %arg10[%c0_25, %c0_26], %31 {strides = array<i32>} : memref<8x32xf32, #tpu.memory_space<vmem>>, vector<8x32xf32>,
    } else {
    }
    %c0 = arith.constant 0 : index
    %c0_1 = arith.constant 0 : index
    %3 = vector.load %arg2[%c0, %c0_1] : memref<8x32xf32, #tpu.memory_space<vmem>>, vector<8x32xf32>
    %c0_2 = arith.constant 0 : index
    %c0_3 = arith.constant 0 : index
    %4 = vector.load %arg4[%c0_2, %c0_3] : memref<8x32xf32, #tpu.memory_space<vmem>>, vector<8x32xf32>
    %c0_4 = arith.constant 0 : index
    %c0_5 = arith.constant 0 : index
    %5 = vector.load %arg3[%c0_4, %c0_5] : memref<8x1024xf32, #tpu.memory_space<vmem>>, vector<8x1024xf32>
    %c0_6 = arith.constant 0 : index
    %c0_7 = arith.constant 0 : index
    %6 = vector.load %arg5[%c0_6, %c0_7] : memref<32x1024xf32, #tpu.memory_space<vmem>>, vector<32x1024xf32>
    %cst = arith.constant dense<0.000000e+00> : vector<8x1024xf32>
    %7 = tpu.matmul %3, %6, %cst {dimension_numbers = #tpu.dot_dimension_numbers<[1], [0], [0], [1], [0, 0, 1, 1], [], []>} : vector<8x32xf32>, vector<32x1024xf32>, vector<8x1024xf32> -> vector<8x1024xf32>
    %8 = arith.mulf %5, %7 : vector<8x1024xf32>
    %c0_8 = arith.constant 0 : index
    %c0_9 = arith.constant 0 : index
    %9 = vector.load %arg7[%c0_8, %c0_9] : memref<1024x32xf32, #tpu.memory_space<vmem>>, vector<1024x32xf32>
    %cst_10 = arith.constant dense<0.000000e+00> : vector<8x32xf32>
    %10 = tpu.matmul %8, %9, %cst_10 {dimension_numbers = #tpu.dot_dimension_numbers<[1], [0], [0], [1], [0, 0, 1, 1], [], []>} : vector<8x1024xf32>, vector<1024x32xf32>, vector<8x32xf32> -> vector<8x32xf32>
    %c0_11 = arith.constant 0 : index
    %c0_12 = arith.constant 0 : index
    %11 = vector.load %arg6[%c0_11, %c0_12] : memref<32x1024xf32, #tpu.memory_space<vmem>>, vector<32x1024xf32>
    %cst_13 = arith.constant dense<0.000000e+00> : vector<8x1024xf32>
    %12 = tpu.matmul %4, %11, %cst_13 {dimension_numbers = #tpu.dot_dimension_numbers<[1], [0], [0], [1], [0, 0, 1, 1], [], []>} : vector<8x32xf32>, vector<32x1024xf32>, vector<8x1024xf32> -> vector<8x1024xf32>
    %13 = arith.mulf %5, %12 : vector<8x1024xf32>
    %c0_14 = arith.constant 0 : index
    %c0_15 = arith.constant 0 : index
    %14 = vector.load %arg8[%c0_14, %c0_15] : memref<1024x32xf32, #tpu.memory_space<vmem>>, vector<1024x32xf32>
    %cst_16 = arith.constant dense<0.000000e+00> : vector<8x32xf32>
    %15 = tpu.matmul %13, %14, %cst_16 {dimension_numbers = #tpu.dot_dimension_numbers<[1], [0], [0], [1], [0, 0, 1, 1], [], []>} : vector<8x1024xf32>, vector<1024x32xf32>, vector<8x32xf32> -> vector<8x32xf32>
    %16 = arith.mulf %3, %3 : vector<8x32xf32>
    %17 = arith.mulf %4, %4 : vector<8x32xf32>
    %18 = arith.addf %16, %17 : vector<8x32xf32>
    %cst_17 = arith.constant 2.000000e+00 : f32
    %19 = vector.broadcast %cst_17 : f32 to vector<8x32xf32>
    %20 = arith.mulf %19, %18 : vector<8x32xf32>
    %21 = arith.mulf %10, %10 : vector<8x32xf32>
    %22 = arith.addf %20, %21 : vector<8x32xf32>
    %23 = arith.mulf %15, %15 : vector<8x32xf32>
    %24 = arith.addf %22, %23 : vector<8x32xf32>
    %c0_18 = arith.constant 0 : index
    %c0_19 = arith.constant 0 : index
    %25 = vector.load %arg10[%c0_18, %c0_19] : memref<8x32xf32, #tpu.memory_space<vmem>>, vector<8x32xf32>
    %26 = arith.addf %25, %24 : vector<8x32xf32>
    %c0_20 = arith.constant 0 : index
    %c0_21 = arith.constant 0 : index
    %27 = vector.load %arg10[%c0_20, %c0_21] : memref<8x32xf32, #tpu.memory_space<vmem>>, vector<8x32xf32>
    tpu.vector_store %arg10[%c0_20, %c0_21], %26 {strides = array<i32>} : memref<8x32xf32, #tpu.memory_space<vmem>>, vector<8x32xf32>,
    %c0_i32_22 = arith.constant 0 : i32
    %28 = arith.cmpi eq, %arg1, %c0_i32_22 : i32
    %29 = arith.extui %28 : i1 to i32
    %c0_i32_23 = arith.constant 0 : i32
    %30 = arith.cmpi ne, %29, %c0_i32_23 : i32
    scf.if %30 {
      %c0_24 = arith.constant 0 : index
      %c0_25 = arith.constant 0 : index
      %31 = vector.load %arg10[%c0_24, %c0_25] : memref<8x32xf32, #tpu.memory_space<vmem>>, vector<8x32xf32>
      %32 = vector.shape_cast %31 : vector<8x32xf32> to vector<1x8x32xf32>
      %cst_26 = arith.constant dense<0.000000e+00> : vector<1xf32>
      %33 = vector.multi_reduction <add>, %32, %cst_26 [1, 2] : vector<1x8x32xf32> to vector<1xf32>
      %34 = vector.shape_cast %33 : vector<1xf32> to vector<1x1x1xf32>
      %35 = vector.extract %34[0, 0, 0] : f32 from vector<1x1x1xf32>
      %c0_27 = arith.constant 0 : index
      %c0_28 = arith.constant 0 : index
      %36 = memref.load %arg9[%c0_27, %c0_28] : memref<1x1xf32, #tpu.memory_space<smem>>
      memref.store %35, %arg9[%c0_27, %c0_28] : memref<1x1xf32, #tpu.memory_space<smem>>
    } else {
    }
    return
  }
  func.func @transform_0(%arg0: i32, %arg1: i32) -> (i32, i32) {
    %c1_i32 = arith.constant 1 : i32
    %0 = arith.muli %arg0, %c1_i32 : i32
    %1 = arith.addi %0, %arg1 : i32
    %c0_i32 = arith.constant 0 : i32
    %2 = arith.minsi %1, %c0_i32 : i32
    %c0_i32_0 = arith.constant 0 : i32
    %c0_i32_1 = arith.constant 0 : i32
    return %2, %c0_i32_0 : i32, i32
  }
  func.func @transform_1(%arg0: i32, %arg1: i32) -> (i32, i32) {
    %c1_i32 = arith.constant 1 : i32
    %0 = arith.muli %arg0, %c1_i32 : i32
    %1 = arith.addi %0, %arg1 : i32
    %c0_i32 = arith.constant 0 : i32
    %2 = arith.minsi %1, %c0_i32 : i32
    %c0_i32_0 = arith.constant 0 : i32
    %c0_i32_1 = arith.constant 0 : i32
    return %2, %c0_i32_0 : i32, i32
  }
  func.func @transform_2(%arg0: i32, %arg1: i32) -> (i32, i32) {
    %c1_i32 = arith.constant 1 : i32
    %0 = arith.muli %arg0, %c1_i32 : i32
    %1 = arith.addi %0, %arg1 : i32
    %c0_i32 = arith.constant 0 : i32
    %2 = arith.minsi %1, %c0_i32 : i32
    %c0_i32_0 = arith.constant 0 : i32
    %c0_i32_1 = arith.constant 0 : i32
    return %2, %c0_i32_0 : i32, i32
  }
  func.func @transform_3(%arg0: i32, %arg1: i32) -> (i32, i32) {
    %c0_i32 = arith.constant 0 : i32
    %c0_i32_0 = arith.constant 0 : i32
    %c0_i32_1 = arith.constant 0 : i32
    return %c0_i32, %c0_i32_0 : i32, i32
  }
  func.func @transform_4(%arg0: i32, %arg1: i32) -> (i32, i32) {
    %c0_i32 = arith.constant 0 : i32
    %c0_i32_0 = arith.constant 0 : i32
    %c0_i32_1 = arith.constant 0 : i32
    return %c0_i32, %c0_i32_0 : i32, i32
  }
  func.func @transform_5(%arg0: i32, %arg1: i32) -> (i32, i32) {
    %c0_i32 = arith.constant 0 : i32
    %c0_i32_0 = arith.constant 0 : i32
    %c0_i32_1 = arith.constant 0 : i32
    return %c0_i32, %c0_i32_0 : i32, i32
  }
  func.func @transform_6(%arg0: i32, %arg1: i32) -> (i32, i32) {
    %c0_i32 = arith.constant 0 : i32
    %c0_i32_0 = arith.constant 0 : i32
    %c0_i32_1 = arith.constant 0 : i32
    return %c0_i32, %c0_i32_0 : i32, i32
  }
  func.func @transform_7(%arg0: i32, %arg1: i32) -> (i32, i32) {
    %c0_i32 = arith.constant 0 : i32
    %c0_i32_0 = arith.constant 0 : i32
    return %arg0, %c0_i32 : i32, i32
  }
}

</mosaic_0001>

<bundles_post_ra>
// kernel: tpu_custom_call.1
= control target key start
LH: loop header
LB: loop body
LE: loop exit
PB: predicated region body
PF: predicated region fallthrough
CT: control target
= control target key end

     0   :  { %vm115_vm0 = vcmask 261120   ;;  %v1959_v6 = vmov 0.0   ;;  %s3060_s0 = inlined_call_operand.vmem [shape: f32[8,32], index: 0, kind: input, shape index: {}]   ;;  %s3061_s1 = inlined_call_operand.vmem [shape: f32[8,1024], index: 1, kind: input, shape index: {}]   ;;  %s3062_s2 = inlined_call_operand.vmem [shape: f32[8,32], index: 2, kind: input, shape index: {}]   ;;  %s3063_s3 = inlined_call_operand.vmem [shape: f32[32,1024], index: 3, kind: input, shape index: {}]   ;;  %s3064_s4 = inlined_call_operand.vmem [shape: f32[32,1024], index: 4, kind: input, shape index: {}]   ;;  %s3065_s5 = inlined_call_operand.vmem [shape: f32[1024,32], index: 5, kind: input, shape index: {}]   ;;  %s3066_s6 = inlined_call_operand.vmem [shape: f32[1024,32], index: 6, kind: input, shape index: {}]   ;;  %s3067_s7 = inlined_call_operand.hbm [shape: f32[1,1], index: 7, kind: output, shape index: {}]  }
   0x1   :  { %v152_v0 = vld [vmem:[%s3063_s3 + $0xc8] sm:$0xff]  ;;  %v154_v1 = vld [vmem:[%s3063_s3 + $0xd8] sm:$0xff]  ;;  %v151_v2 = vld [vmem:[%s3063_s3 + $0xc0] sm:$0xff]  ;;  %116 = vst.msk [vmem:[#allocation2] sm:$0xff] %vm115_vm0, %v1959_v6  ;;  %227 = vmatprep.mubr.f32.mxu0 %v1959_v6  ;;  %298 = vmatprep.mubr.f32.mxu1 %v1959_v6 }
   0x2   :  { %187 = vmatprep.subr.mxu0 %v152_v0  ;;  %258 = vmatprep.subr.mxu1 %v154_v1  ;;  %v153_v3 = vld [vmem:[%s3063_s3 + $0xd0] sm:$0xff]  ;;  %v144_v4 = vld [vmem:[%s3063_s3 + $0x88] sm:$0xff]  ;;  %v146_v5 = vld [vmem:[%s3063_s3 + $0x98] sm:$0xff] }
   0x3   :  { %188 = vmatpush1.msra.mxu0 %v151_v2  ;;  %259 = vmatpush1.msra.mxu1 %v153_v3  ;;  %v143_v7 = vld [vmem:[%s3063_s3 + $0x80] sm:$0xff]  ;;  %v145_v8 = vld [vmem:[%s3063_s3 + $0x90] sm:$0xff]  ;;  %v136_v9 = vld [vmem:[%s3063_s3 + $0x48] sm:$0xff] }
   0x4   :  { %189 = vmatprep.subr.mxu0 %v144_v4  ;;  %260 = vmatprep.subr.mxu1 %v146_v5  ;;  %v138_v10 = vld [vmem:[%s3063_s3 + $0x58] sm:$0xff]  ;;  %v135_v11 = vld [vmem:[%s3063_s3 + $0x40] sm:$0xff]  ;;  %v137_v12 = vld [vmem:[%s3063_s3 + $0x50] sm:$0xff] }
   0x5   :  { %190 = vmatpush1.msra.mxu0 %v143_v7  ;;  %261 = vmatpush1.msra.mxu1 %v145_v8  ;;  %v128_v13 = vld [vmem:[%s3063_s3 + $0x8] sm:$0xff]  ;;  %v130_v14 = vld [vmem:[%s3063_s3 + $0x18] sm:$0xff]  ;;  %v127_v15 = vld [vmem:[%s3063_s3] sm:$0xff] }
   0x6   :  { %191 = vmatprep.subr.mxu0 %v136_v9  ;;  %262 = vmatprep.subr.mxu1 %v138_v10  ;;  %v129_v16 = vld [vmem:[%s3063_s3 + $0x10] sm:$0xff]  ;;  %v117_v17 = vld [vmem:[%s3060_s0] sm:$0xff]  ;;  %v156_v18 = vld [vmem:[%s3063_s3 + $0xe8] sm:$0xff] }
   0x7   :  { %192 = vmatpush1.msra.mxu0 %v135_v11  ;;  %263 = vmatpush1.msra.mxu1 %v137_v12  ;;  %v158_v19 = vld [vmem:[%s3063_s3 + $0xf8] sm:$0xff]  ;;  %v155_v20 = vld [vmem:[%s3063_s3 + $0xe0] sm:$0xff]  ;;  %v157_v21 = vld [vmem:[%s3063_s3 + $0xf0] sm:$0xff] }
   0x8   :  { %193 = vmatprep.subr.mxu0 %v128_v13  ;;  %264 = vmatprep.subr.mxu1 %v130_v14  ;;  %v148_v22 = vld [vmem:[%s3063_s3 + $0xa8] sm:$0xff]  ;;  %v150_v23 = vld [vmem:[%s3063_s3 + $0xb8] sm:$0xff]  ;;  %v147_v24 = vld [vmem:[%s3063_s3 + $0xa0] sm:$0xff] }
   0x9   :  { %194 = vmatpush1.msra.mxu0 %v127_v15  ;;  %265 = vmatpush1.msra.mxu1 %v129_v16  ;;  %v149_v25 = vld [vmem:[%s3063_s3 + $0xb0] sm:$0xff]  ;;  %v140_v26 = vld [vmem:[%s3063_s3 + $0x68] sm:$0xff]  ;;  %v142_v27 = vld [vmem:[%s3063_s3 + $0x78] sm:$0xff] }
   0xa   :  { %1656 = vmatmul.mubr.msk.f32.vlgmr.msra.gmra.mxu0 %vm115_vm0, %v117_v17  ;;  %1657 = vmatmul.mubr.msk.f32.vlgmr.msra.gmra.mxu1 %vm115_vm0, %v117_v17  ;;  %v139_v28 = vld [vmem:[%s3063_s3 + $0x60] sm:$0xff]  ;;  %v141_v29 = vld [vmem:[%s3063_s3 + $0x70] sm:$0xff]  ;;  %v132_v30 = vld [vmem:[%s3063_s3 + $0x28] sm:$0xff] }
   0xb   :  { %329 = vmatprep.subr.mxu0 %v156_v18  ;;  %400 = vmatprep.subr.mxu1 %v158_v19  ;;  %v131_v31 = vld [vmem:[%s3063_s3 + $0x20] sm:$0xff]  ;;  %v134_v32 = vld [vmem:[%s3063_s3 + $0x38] sm:$0xff]  ;;  %v133_v33 = vld [vmem:[%s3063_s3 + $0x30] sm:$0xff] }
   0xc   :  { %330 = vmatpush1.msra.mxu0 %v155_v20  ;;  %401 = vmatpush1.msra.mxu1 %v157_v21  ;;  %v486_v34 = vld [vmem:[%s3065_s5 + $0xf8] sm:$0xff]  ;;  %v485_v38 = vld [vmem:[%s3065_s5 + $0xf0] sm:$0xff]  ;;  %v484_v42 = vld [vmem:[%s3065_s5 + $0xe8] sm:$0xff] }
   0xd   :  { %331 = vmatprep.subr.mxu0 %v148_v22  ;;  %402 = vmatprep.subr.mxu1 %v150_v23  ;;  %v518_v35 = vld [vmem:[%s3065_s5 + $0x1f8] sm:$0xff]  ;;  %v517_v39 = vld [vmem:[%s3065_s5 + $0x1f0] sm:$0xff]  ;;  %v516_v43 = vld [vmem:[%s3065_s5 + $0x1e8] sm:$0xff] }
   0xe   :  { %332 = vmatpush1.msra.mxu0 %v147_v24  ;;  %403 = vmatpush1.msra.mxu1 %v149_v25  ;;  %v470_v36 = vld [vmem:[%s3065_s5 + $0x78] sm:$0xff]  ;;  %v469_v40 = vld [vmem:[%s3065_s5 + $0x70] sm:$0xff]  ;;  %v468_v44 = vld [vmem:[%s3065_s5 + $0x68] sm:$0xff] }
   0xf   :  { %333 = vmatprep.subr.mxu0 %v140_v26  ;;  %404 = vmatprep.subr.mxu1 %v142_v27  ;;  %v502_v37 = vld [vmem:[%s3065_s5 + $0x178] sm:$0xff]  ;;  %v501_v41 = vld [vmem:[%s3065_s5 + $0x170] sm:$0xff]  ;;  %v500_v45 = vld [vmem:[%s3065_s5 + $0x168] sm:$0xff] }
  0x10   :  { %334 = vmatpush1.msra.mxu0 %v139_v28  ;;  %405 = vmatpush1.msra.mxu1 %v141_v29  ;;  %v483_v46 = vld [vmem:[%s3065_s5 + $0xe0] sm:$0xff]  ;;  %v482_v50 = vld [vmem:[%s3065_s5 + $0xd8] sm:$0xff]  ;;  %v481_v54 = vld [vmem:[%s3065_s5 + $0xd0] sm:$0xff] }
  0x11   :  { %335 = vmatprep.subr.mxu0 %v132_v30  ;;  %369 = vmatprep.mubr.f32.mxu0 %v1959_v6  ;;  %v515_v47 = vld [vmem:[%s3065_s5 + $0x1e0] sm:$0xff]  ;;  %v514_v51 = vld [vmem:[%s3065_s5 + $0x1d8] sm:$0xff]  ;;  %v513_v55 = vld [vmem:[%s3065_s5 + $0x1d0] sm:$0xff] }
  0x12   :  { %336 = vmatpush1.msra.mxu0 %v131_v31  ;;  %406 = vmatprep.subr.mxu1 %v134_v32  ;;  %v467_v48 = vld [vmem:[%s3065_s5 + $0x60] sm:$0xff]  ;;  %v466_v52 = vld [vmem:[%s3065_s5 + $0x58] sm:$0xff]  ;;  %v465_v56 = vld [vmem:[%s3065_s5 + $0x50] sm:$0xff] }
  0x13   :  { %1658 = vmatmul.mubr.msk.f32.vlgmr.msra.gmra.mxu0 %vm115_vm0, %v117_v17  ;;  %407 = vmatpush1.msra.mxu1 %v133_v33  ;;  %v499_v49 = vld [vmem:[%s3065_s5 + $0x160] sm:$0xff]  ;;  %v498_v53 = vld [vmem:[%s3065_s5 + $0x158] sm:$0xff]  ;;  %v497_v57 = vld [vmem:[%s3065_s5 + $0x150] sm:$0xff] }
  0x14   :  { %440 = vmatprep.mubr.f32.mxu1 %v1959_v6  ;;  %1664 = vmatprep.subr.mxu0 %v486_v34 }
  0x15   :  { %1659 = vmatmul.mubr.msk.f32.vlgmr.msra.gmra.mxu1 %vm115_vm0, %v117_v17  ;;  %1699 = vmatprep.subr.mxu1 %v518_v35 }
  0x16   :  { %1665 = vmatpush3.msra.mxu0 %v470_v36  ;;  %1700 = vmatpush3.msra.mxu1 %v502_v37 }
  0x17   :  { %1666 = vmatprep.subr.mxu0 %v485_v38  ;;  %1701 = vmatprep.subr.mxu1 %v517_v39 }
  0x18   :  { %1667 = vmatpush3.msra.mxu0 %v469_v40  ;;  %1702 = vmatpush3.msra.mxu1 %v501_v41 }
  0x19   :  { %1668 = vmatprep.subr.mxu0 %v484_v42  ;;  %1703 = vmatprep.subr.mxu1 %v516_v43 }
  0x1a   :  { %1669 = vmatpush3.msra.mxu0 %v468_v44  ;;  %1704 = vmatpush3.msra.mxu1 %v500_v45 }
  0x1b   :  { %1670 = vmatprep.subr.mxu0 %v483_v46  ;;  %1705 = vmatprep.subr.mxu1 %v515_v47 }
  0x1c   :  { %1671 = vmatpush3.msra.mxu0 %v467_v48  ;;  %1706 = vmatpush3.msra.mxu1 %v499_v49 }
  0x1d   :  { %1672 = vmatprep.subr.mxu0 %v482_v50  ;;  %1707 = vmatprep.subr.mxu1 %v514_v51 }
  0x1e   :  { %12 = vsyncpa [#allocation4], 0  ;;  %1673 = vmatpush3.msra.mxu0 %v466_v52  ;;  %1708 = vmatpush3.msra.mxu1 %v498_v53  ;;  %v480_v58 = vld [vmem:[%s3065_s5 + $0xc8] sm:$0xff]  ;;  %v479_v62 = vld [vmem:[%s3065_s5 + $0xc0] sm:$0xff] }
  0x1f   :  { %v512_v59 = vld [vmem:[%s3065_s5 + $0x1c8] sm:$0xff]  ;;  %1674 = vmatprep.subr.mxu0 %v481_v54  ;;  %1709 = vmatprep.subr.mxu1 %v513_v55  ;;  %v511_v63 = vld [vmem:[%s3065_s5 + $0x1c0] sm:$0xff]  ;;  %v478_v2 = vld [vmem:[%s3065_s5 + $0xb8] sm:$0xff] }
  0x20   :  { %v464_v60 = vld [vmem:[%s3065_s5 + $0x48] sm:$0xff]  ;;  %1675 = vmatpush3.msra.mxu0 %v465_v56  ;;  %1710 = vmatpush3.msra.mxu1 %v497_v57  ;;  %v463_v0 = vld [vmem:[%s3065_s5 + $0x40] sm:$0xff]  ;;  %v510_v3 = vld [vmem:[%s3065_s5 + $0x1b8] sm:$0xff] }
  0x21   :  { %v496_v61 = vld [vmem:[%s3065_s5 + $0x148] sm:$0xff]  ;;  %1676 = vmatprep.subr.mxu0 %v480_v58  ;;  %1711 = vmatprep.subr.mxu1 %v512_v59  ;;  %v495_v1 = vld [vmem:[%s3065_s5 + $0x140] sm:$0xff]  ;;  %v462_v4 = vld [vmem:[%s3065_s5 + $0x38] sm:$0xff] }
  0x22   :  { %1677 = vmatpush3.msra.mxu0 %v464_v60  ;;  %1712 = vmatpush3.msra.mxu1 %v496_v61  ;;  %v494_v5 = vld [vmem:[%s3065_s5 + $0x138] sm:$0xff]  ;;  %v477_v7 = vld [vmem:[%s3065_s5 + $0xb0] sm:$0xff]  ;;  %v476_v11 = vld [vmem:[%s3065_s5 + $0xa8] sm:$0xff] }
  0x23   :  { %1678 = vmatprep.subr.mxu0 %v479_v62  ;;  %1713 = vmatprep.subr.mxu1 %v511_v63  ;;  %v509_v8 = vld [vmem:[%s3065_s5 + $0x1b0] sm:$0xff]  ;;  %v508_v12 = vld [vmem:[%s3065_s5 + $0x1a8] sm:$0xff]  ;;  %v475_v15 = vld [vmem:[%s3065_s5 + $0xa0] sm:$0xff] }
  0x24   :  { %1679 = vmatpush3.msra.mxu0 %v463_v0  ;;  %1714 = vmatpush3.msra.mxu1 %v495_v1  ;;  %v461_v9 = vld [vmem:[%s3065_s5 + $0x30] sm:$0xff]  ;;  %v460_v13 = vld [vmem:[%s3065_s5 + $0x28] sm:$0xff]  ;;  %v507_v16 = vld [vmem:[%s3065_s5 + $0x1a0] sm:$0xff] }
  0x25   :  { %1680 = vmatprep.subr.mxu0 %v478_v2  ;;  %1715 = vmatprep.subr.mxu1 %v510_v3  ;;  %v493_v10 = vld [vmem:[%s3065_s5 + $0x130] sm:$0xff]  ;;  %v492_v14 = vld [vmem:[%s3065_s5 + $0x128] sm:$0xff]  ;;  %v459_v17 = vld [vmem:[%s3065_s5 + $0x20] sm:$0xff] }
  0x26   :  { %1681 = vmatpush3.msra.mxu0 %v462_v4  ;;  %1716 = vmatpush3.msra.mxu1 %v494_v5  ;;  %v491_v18 = vld [vmem:[%s3065_s5 + $0x120] sm:$0xff]  ;;  %v474_v19 = vld [vmem:[%s3065_s5 + $0x98] sm:$0xff]  ;;  %v473_v23 = vld [vmem:[%s3065_s5 + $0x90] sm:$0xff] }
  0x27   :  { %1682 = vmatprep.subr.mxu0 %v477_v7  ;;  %1717 = vmatprep.subr.mxu1 %v509_v8  ;;  %v506_v20 = vld [vmem:[%s3065_s5 + $0x198] sm:$0xff]  ;;  %v505_v24 = vld [vmem:[%s3065_s5 + $0x190] sm:$0xff]  ;;  %v472_v27 = vld [vmem:[%s3065_s5 + $0x88] sm:$0xff] }
  0x28   :  { %1683 = vmatpush3.msra.mxu0 %v461_v9  ;;  %1718 = vmatpush3.msra.mxu1 %v493_v10  ;;  %v458_v21 = vld [vmem:[%s3065_s5 + $0x18] sm:$0xff]  ;;  %v457_v25 = vld [vmem:[%s3065_s5 + $0x10] sm:$0xff]  ;;  %v504_v28 = vld [vmem:[%s3065_s5 + $0x188] sm:$0xff] }
  0x29   :  { %1684 = vmatprep.subr.mxu0 %v476_v11  ;;  %1719 = vmatprep.subr.mxu1 %v508_v12  ;;  %v490_v22 = vld [vmem:[%s3065_s5 + $0x118] sm:$0xff]  ;;  %v489_v26 = vld [vmem:[%s3065_s5 + $0x110] sm:$0xff]  ;;  %v456_v29 = vld [vmem:[%s3065_s5 + $0x8] sm:$0xff] }
  0x2a   :  { %1685 = vmatpush3.msra.mxu0 %v460_v13  ;;  %1720 = vmatpush3.msra.mxu1 %v492_v14  ;;  %v488_v30 = vld [vmem:[%s3065_s5 + $0x108] sm:$0xff]  ;;  %v471_v31 = vld [vmem:[%s3065_s5 + $0x80] sm:$0xff]  ;;  %v550_v35 = vld [vmem:[%s3065_s5 + $0x2f8] sm:$0xff] }
  0x2b   :  { %1686 = vmatprep.subr.mxu0 %v475_v15  ;;  %1721 = vmatprep.subr.mxu1 %v507_v16  ;;  %v503_v32 = vld [vmem:[%s3065_s5 + $0x180] sm:$0xff]  ;;  %v582_v36 = vld [vmem:[%s3065_s5 + $0x3f8] sm:$0xff]  ;;  %v2311_v37 = vld [vmem:[%s3061_s1 + $0x10] sm:$0xff] }
  0x2c   :  { %1687 = vmatpush3.msra.mxu0 %v459_v17  ;;  %1722 = vmatpush3.msra.mxu1 %v491_v18  ;;  %v455_v33 = vld [vmem:[%s3065_s5] sm:$0xff]  ;;  %v2316_v40 = vld [vmem:[%s3061_s1 + $0x8] sm:$0xff]  ;;  %v2321_v41 = vld [vmem:[%s3061_s1 + $0x18] sm:$0xff] }
  0x2d   :  { %1688 = vmatprep.subr.mxu0 %v474_v19  ;;  %1723 = vmatprep.subr.mxu1 %v506_v20  ;;  %v487_v34 = vld [vmem:[%s3065_s5 + $0x100] sm:$0xff]  ;;  %v534_v49 = vld [vmem:[%s3065_s5 + $0x278] sm:$0xff]  ;;  %v549_v51 = vld [vmem:[%s3065_s5 + $0x2f0] sm:$0xff] }
  0x2e   :  { %1689 = vmatpush3.msra.mxu0 %v458_v21  ;;  %1724 = vmatpush3.msra.mxu1 %v490_v22  ;;  %v2326_v42 = vld [vmem:[%s3061_s1] sm:$0xff]  ;;  %v566_v50 = vld [vmem:[%s3065_s5 + $0x378] sm:$0xff]  ;;  %v581_v52 = vld [vmem:[%s3065_s5 + $0x3f0] sm:$0xff] }
  0x2f   :  { %1690 = vmatprep.subr.mxu0 %v473_v23  ;;  %1725 = vmatprep.subr.mxu1 %v505_v24  ;;  %v533_v53 = vld [vmem:[%s3065_s5 + $0x270] sm:$0xff]  ;;  %v548_v55 = vld [vmem:[%s3065_s5 + $0x2e8] sm:$0xff]  ;;  %v547_v59 = vld [vmem:[%s3065_s5 + $0x2e0] sm:$0xff] }
  0x30   :  { %1691 = vmatpush3.msra.mxu0 %v457_v25  ;;  %1726 = vmatpush3.msra.mxu1 %v489_v26  ;;  %v565_v54 = vld [vmem:[%s3065_s5 + $0x370] sm:$0xff]  ;;  %v580_v56 = vld [vmem:[%s3065_s5 + $0x3e8] sm:$0xff]  ;;  %v579_v60 = vld [vmem:[%s3065_s5 + $0x3e0] sm:$0xff] }
  0x31   :  { %1692 = vmatprep.subr.mxu0 %v472_v27  ;;  %1727 = vmatprep.subr.mxu1 %v504_v28  ;;  %v532_v57 = vld [vmem:[%s3065_s5 + $0x268] sm:$0xff]  ;;  %v531_v61 = vld [vmem:[%s3065_s5 + $0x260] sm:$0xff]  ;;  %v546_v63 = vld [vmem:[%s3065_s5 + $0x2d8] sm:$0xff] }
  0x32   :  { %1693 = vmatpush3.msra.mxu0 %v456_v29  ;;  %1728 = vmatpush3.msra.mxu1 %v488_v30  ;;  %v564_v58 = vld [vmem:[%s3065_s5 + $0x368] sm:$0xff]  ;;  %v563_v62 = vld [vmem:[%s3065_s5 + $0x360] sm:$0xff]  ;;  %v578_v0 = vld [vmem:[%s3065_s5 + $0x3d8] sm:$0xff] }
  0x33   :  { %1694 = vmatprep.subr.mxu0 %v471_v31  ;;  %1729 = vmatprep.subr.mxu1 %v503_v32  ;;  %v530_v1 = vld [vmem:[%s3065_s5 + $0x258] sm:$0xff]  ;;  %v545_v3 = vld [vmem:[%s3065_s5 + $0x2d0] sm:$0xff]  ;;  %v544_v8 = vld [vmem:[%s3065_s5 + $0x2c8] sm:$0xff] }
  0x34   :  { %1695 = vmatpush3.msra.mxu0 %v455_v33  ;;  %1730 = vmatpush3.msra.mxu1 %v487_v34  ;;  %v562_v2 = vld [vmem:[%s3065_s5 + $0x358] sm:$0xff]  ;;  %v577_v4 = vld [vmem:[%s3065_s5 + $0x3d0] sm:$0xff]  ;;  %v576_v9 = vld [vmem:[%s3065_s5 + $0x3c8] sm:$0xff] }
  0x35   :  { %1734 = vmatprep.subr.mxu0 %v550_v35  ;;  %1769 = vmatprep.subr.mxu1 %v582_v36  ;;  %v529_v5 = vld [vmem:[%s3065_s5 + $0x250] sm:$0xff]  ;;  %v528_v10 = vld [vmem:[%s3065_s5 + $0x248] sm:$0xff]  ;;  %v543_v12 = vld [vmem:[%s3065_s5 + $0x2c0] sm:$0xff] }
  0x36   :  { %v561_v7 = vld [vmem:[%s3065_s5 + $0x350] sm:$0xff]  ;;  %v560_v11 = vld [vmem:[%s3065_s5 + $0x348] sm:$0xff]  ;;  %v575_v13 = vld [vmem:[%s3065_s5 + $0x3c0] sm:$0xff] }
  0x37   :  { %v527_v14 = vld [vmem:[%s3065_s5 + $0x240] sm:$0xff]  ;;  %v542_v16 = vld [vmem:[%s3065_s5 + $0x2b8] sm:$0xff]  ;;  %v541_v20 = vld [vmem:[%s3065_s5 + $0x2b0] sm:$0xff] }
  0x38   :  { %v559_v15 = vld [vmem:[%s3065_s5 + $0x340] sm:$0xff]  ;;  %v574_v17 = vld [vmem:[%s3065_s5 + $0x3b8] sm:$0xff]  ;;  %v573_v21 = vld [vmem:[%s3065_s5 + $0x3b0] sm:$0xff] }
  0x39   :  { %v526_v18 = vld [vmem:[%s3065_s5 + $0x238] sm:$0xff]  ;;  %v525_v22 = vld [vmem:[%s3065_s5 + $0x230] sm:$0xff]  ;;  %v540_v24 = vld [vmem:[%s3065_s5 + $0x2a8] sm:$0xff] }
  0x3a   :  { %v558_v19 = vld [vmem:[%s3065_s5 + $0x338] sm:$0xff]  ;;  %v557_v23 = vld [vmem:[%s3065_s5 + $0x330] sm:$0xff]  ;;  %v572_v25 = vld [vmem:[%s3065_s5 + $0x3a8] sm:$0xff] }
  0x3b   :  { %v524_v26 = vld [vmem:[%s3065_s5 + $0x228] sm:$0xff]  ;;  %v539_v28 = vld [vmem:[%s3065_s5 + $0x2a0] sm:$0xff]  ;;  %v538_v33 = vld [vmem:[%s3065_s5 + $0x298] sm:$0xff] }
  0x3c   :  { %v556_v27 = vld [vmem:[%s3065_s5 + $0x328] sm:$0xff]  ;;  %v571_v29 = vld [vmem:[%s3065_s5 + $0x3a0] sm:$0xff]  ;;  %v570_v34 = vld [vmem:[%s3065_s5 + $0x398] sm:$0xff] }
  0x3d   :  { %v523_v31 = vld [vmem:[%s3065_s5 + $0x220] sm:$0xff]  ;;  %v522_v36 = vld [vmem:[%s3065_s5 + $0x218] sm:$0xff] }
  0x3e   :  { %v555_v32 = vld [vmem:[%s3065_s5 + $0x320] sm:$0xff] }
  0xca   :  { %v229_v38 = vpop.f32.mrf.mxu0  ;;  %v300_v39 = vpop.f32.mrf.mxu1 }
  0xcb   :  { %v449_v43 = vmul.f32 %v300_v39, %v2311_v37  ;;  %v447_v48 = vmul.f32 %v229_v38, %v2326_v42  ;;  %v554_v38 = vld [vmem:[%s3065_s5 + $0x318] sm:$0xff]  ;;  %v537_v39 = vld [vmem:[%s3065_s5 + $0x290] sm:$0xff] }
  0xcc   :  { %v231_v44 = vpop.f32.mrf.mxu0  ;;  %v302_v45 = vpop.f32.mrf.mxu1 }
  0xcd   :  { %v448_v46 = vmul.f32 %v231_v44, %v2316_v40  ;;  %v450_v47 = vmul.f32 %v302_v45, %v2321_v41  ;;  %v2491_v44 = vld [vmem:[%s3061_s1 + $0x28] sm:$0xff] }
  0xcf   :  { %647 = vmatprep.mubr.f32.mxu0 %v448_v46  ;;  %717 = vmatprep.mubr.f32.mxu1 %v450_v47  ;;  %v521_v46 = vld [vmem:[%s3065_s5 + $0x210] sm:$0xff] }
  0xd0   :  { %648 = vmatmul.mubr.f32.vlgmr.msra.gmra.mxu0 %v447_v48  ;;  %718 = vmatmul.mubr.f32.vlgmr.msra.gmra.mxu1 %v449_v43  ;;  %v569_v43 = vld [vmem:[%s3065_s5 + $0x390] sm:$0xff]  ;;  %v2502_v48 = vld [vmem:[%s3061_s1 + $0x38] sm:$0xff] }
  0xd1   :  { %1735 = vmatpush3.msra.mxu0 %v534_v49  ;;  %1770 = vmatpush3.msra.mxu1 %v566_v50  ;;  %v553_v47 = vld [vmem:[%s3065_s5 + $0x310] sm:$0xff]  ;;  %v536_v50 = vld [vmem:[%s3065_s5 + $0x288] sm:$0xff] }
  0xd2   :  { %1736 = vmatprep.subr.mxu0 %v549_v51  ;;  %1771 = vmatprep.subr.mxu1 %v581_v52  ;;  %v568_v51 = vld [vmem:[%s3065_s5 + $0x388] sm:$0xff]  ;;  %v2513_v52 = vld [vmem:[%s3061_s1 + $0x30] sm:$0xff] }
  0xd3   :  { %1737 = vmatpush3.msra.mxu0 %v533_v53  ;;  %1772 = vmatpush3.msra.mxu1 %v565_v54  ;;  %v371_v30 = vpop.f32.mrf.mxu0  ;;  %v520_v54 = vld [vmem:[%s3065_s5 + $0x208] sm:$0xff] }
  0xd4   :  { %1738 = vmatprep.subr.mxu0 %v548_v55  ;;  %1773 = vmatprep.subr.mxu1 %v580_v56  ;;  %v552_v55 = vld [vmem:[%s3065_s5 + $0x308] sm:$0xff]  ;;  %v535_v56 = vld [vmem:[%s3065_s5 + $0x280] sm:$0xff] }
  0xd5   :  { %1739 = vmatpush3.msra.mxu0 %v532_v57  ;;  %1774 = vmatpush3.msra.mxu1 %v564_v58  ;;  %v442_v35 = vpop.f32.mrf.mxu1  ;;  %v373_v45 = vpop.f32.mrf.mxu0  ;;  %v2528_v57 = vld [vmem:[%s3061_s1 + $0x20] sm:$0xff] }
  0xd6   :  { %1740 = vmatprep.subr.mxu0 %v547_v59  ;;  %1775 = vmatprep.subr.mxu1 %v579_v60  ;;  %v452_v53 = vmul.f32 %v373_v45, %v2491_v44  ;;  %v567_v59 = vld [vmem:[%s3065_s5 + $0x380] sm:$0xff]  ;;  %v1236_v45 = vld [vmem:[%s3066_s6 + $0x170] sm:$0xff] }
  0xd7   :  { %1741 = vmatpush3.msra.mxu0 %v531_v61  ;;  %1776 = vmatpush3.msra.mxu1 %v563_v62  ;;  %v444_v49 = vpop.f32.mrf.mxu1  ;;  %v519_v60 = vld [vmem:[%s3065_s5 + $0x200] sm:$0xff]  ;;  %v453_v61 = vmul.f32 %v442_v35, %v2513_v52  ;;  %v1253_v35 = vld [vmem:[%s3066_s6 + $0x1f8] sm:$0xff] }
  0xd8   :  { %1742 = vmatprep.subr.mxu0 %v546_v63  ;;  %1777 = vmatprep.subr.mxu1 %v578_v0  ;;  %v454_v58 = vmul.f32 %v444_v49, %v2502_v48  ;;  %v551_v62 = vld [vmem:[%s3065_s5 + $0x300] sm:$0xff]  ;;  %v451_v63 = vmul.f32 %v371_v30, %v2528_v57  ;;  %v888_v0 = vld [vmem:[%s3064_s4 + $0xc8] sm:$0xff]  ;;  %v877_v30 = vld [vmem:[%s3064_s4 + $0x70] sm:$0xff] }
  0xd9   :  { %1743 = vmatpush3.msra.mxu0 %v530_v1  ;;  %1778 = vmatpush3.msra.mxu1 %v562_v2  ;;  %v890_v1 = vld [vmem:[%s3064_s4 + $0xd8] sm:$0xff]  ;;  %v887_v2 = vld [vmem:[%s3064_s4 + $0xc0] sm:$0xff]  ;;  %v1203_v49 = vld [vmem:[%s3066_s6 + $0x68] sm:$0xff] }
  0xda   :  { %1744 = vmatprep.subr.mxu0 %v545_v3  ;;  %1779 = vmatprep.subr.mxu1 %v577_v4  ;;  %v889_v3 = vld [vmem:[%s3064_s4 + $0xd0] sm:$0xff]  ;;  %v880_v4 = vld [vmem:[%s3064_s4 + $0x88] sm:$0xff] }
  0xdb   :  { %1745 = vmatpush3.msra.mxu0 %v529_v5  ;;  %1780 = vmatpush3.msra.mxu1 %v561_v7  ;;  %v882_v5 = vld [vmem:[%s3064_s4 + $0x98] sm:$0xff]  ;;  %v879_v7 = vld [vmem:[%s3064_s4 + $0x80] sm:$0xff] }
  0xdc   :  { %1746 = vmatprep.subr.mxu0 %v544_v8  ;;  %1781 = vmatprep.subr.mxu1 %v576_v9  ;;  %v881_v8 = vld [vmem:[%s3064_s4 + $0x90] sm:$0xff]  ;;  %v872_v9 = vld [vmem:[%s3064_s4 + $0x48] sm:$0xff] }
  0xdd   :  { %1747 = vmatpush3.msra.mxu0 %v528_v10  ;;  %1782 = vmatpush3.msra.mxu1 %v560_v11  ;;  %v874_v10 = vld [vmem:[%s3064_s4 + $0x58] sm:$0xff]  ;;  %v871_v11 = vld [vmem:[%s3064_s4 + $0x40] sm:$0xff] }
  0xde   :  { %1748 = vmatprep.subr.mxu0 %v543_v12  ;;  %1783 = vmatprep.subr.mxu1 %v575_v13  ;;  %v873_v12 = vld [vmem:[%s3064_s4 + $0x50] sm:$0xff]  ;;  %v864_v13 = vld [vmem:[%s3064_s4 + $0x8] sm:$0xff] }
  0xdf   :  { %1749 = vmatpush3.msra.mxu0 %v527_v14  ;;  %1784 = vmatpush3.msra.mxu1 %v559_v15  ;;  %v866_v14 = vld [vmem:[%s3064_s4 + $0x18] sm:$0xff]  ;;  %v863_v15 = vld [vmem:[%s3064_s4] sm:$0xff] }
  0xe0   :  { %1750 = vmatprep.subr.mxu0 %v542_v16  ;;  %1785 = vmatprep.subr.mxu1 %v574_v17  ;;  %v865_v16 = vld [vmem:[%s3064_s4 + $0x10] sm:$0xff]  ;;  %v2593_v17 = vld [vmem:[%s3062_s2] sm:$0xff]  ;;  %s1960_s2 = smov [#allocation3]  }
  0xe1   :  { %1751 = vmatpush3.msra.mxu0 %v526_v18  ;;  %1786 = vmatpush3.msra.mxu1 %v558_v19  ;;  %v892_v18 = vld [vmem:[%s3064_s4 + $0xe8] sm:$0xff]  ;;  %v894_v19 = vld [vmem:[%s3064_s4 + $0xf8] sm:$0xff] }
  0xe2   :  { %1752 = vmatprep.subr.mxu0 %v541_v20  ;;  %1787 = vmatprep.subr.mxu1 %v573_v21  ;;  %v891_v20 = vld [vmem:[%s3064_s4 + $0xe0] sm:$0xff]  ;;  %v893_v21 = vld [vmem:[%s3064_s4 + $0xf0] sm:$0xff] }
  0xe3   :  { %1753 = vmatpush3.msra.mxu0 %v525_v22  ;;  %1788 = vmatpush3.msra.mxu1 %v557_v23  ;;  %v884_v22 = vld [vmem:[%s3064_s4 + $0xa8] sm:$0xff]  ;;  %v886_v23 = vld [vmem:[%s3064_s4 + $0xb8] sm:$0xff] }
  0xe4   :  { %1754 = vmatprep.subr.mxu0 %v540_v24  ;;  %1789 = vmatprep.subr.mxu1 %v572_v25  ;;  %v883_v24 = vld [vmem:[%s3064_s4 + $0xa0] sm:$0xff]  ;;  %v885_v25 = vld [vmem:[%s3064_s4 + $0xb0] sm:$0xff] }
  0xe5   :  { %1755 = vmatpush3.msra.mxu0 %v524_v26  ;;  %1790 = vmatpush3.msra.mxu1 %v556_v27  ;;  %v876_v26 = vld [vmem:[%s3064_s4 + $0x68] sm:$0xff]  ;;  %v878_v27 = vld [vmem:[%s3064_s4 + $0x78] sm:$0xff] }
  0xe6   :  { %1756 = vmatprep.subr.mxu0 %v539_v28  ;;  %1791 = vmatprep.subr.mxu1 %v571_v29  ;;  %v875_v28 = vld [vmem:[%s3064_s4 + $0x60] sm:$0xff]  ;;  %v868_v29 = vld [vmem:[%s3064_s4 + $0x28] sm:$0xff] }
  0xe7   :  { %1757 = vmatpush3.msra.mxu0 %v523_v31  ;;  %1792 = vmatpush3.msra.mxu1 %v555_v32  ;;  %v867_v31 = vld [vmem:[%s3064_s4 + $0x20] sm:$0xff]  ;;  %v870_v32 = vld [vmem:[%s3064_s4 + $0x38] sm:$0xff] }
  0xe8   :  { %1758 = vmatprep.subr.mxu0 %v538_v33  ;;  %1793 = vmatprep.subr.mxu1 %v570_v34  ;;  %v869_v33 = vld [vmem:[%s3064_s4 + $0x30] sm:$0xff]  ;;  %v1221_v34 = vld [vmem:[%s3066_s6 + $0xf8] sm:$0xff] }
  0xe9   :  { %1759 = vmatpush3.msra.mxu0 %v522_v36  ;;  %1794 = vmatpush3.msra.mxu1 %v554_v38  ;;  %v1205_v36 = vld [vmem:[%s3066_s6 + $0x78] sm:$0xff]  ;;  %v1220_v38 = vld [vmem:[%s3066_s6 + $0xf0] sm:$0xff] }
  0xea   :  { %1760 = vmatprep.subr.mxu0 %v537_v39  ;;  %1795 = vmatprep.subr.mxu1 %v569_v43  ;;  %v1252_v39 = vld [vmem:[%s3066_s6 + $0x1f0] sm:$0xff] }
  0xeb   :  { %1761 = vmatpush3.msra.mxu0 %v521_v46  ;;  %1796 = vmatpush3.msra.mxu1 %v553_v47  ;;  %v1204_v43 = vld [vmem:[%s3066_s6 + $0x70] sm:$0xff]  ;;  %v1219_v46 = vld [vmem:[%s3066_s6 + $0xe8] sm:$0xff] }
  0xec   :  { %1762 = vmatprep.subr.mxu0 %v536_v50  ;;  %1797 = vmatprep.subr.mxu1 %v568_v51  ;;  %v1251_v47 = vld [vmem:[%s3066_s6 + $0x1e8] sm:$0xff]  ;;  %v1218_v51 = vld [vmem:[%s3066_s6 + $0xe0] sm:$0xff] }
  0xed   :  { %1763 = vmatpush3.msra.mxu0 %v520_v54  ;;  %1798 = vmatpush3.msra.mxu1 %v552_v55  ;;  %v1235_v50 = vld [vmem:[%s3066_s6 + $0x168] sm:$0xff]  ;;  %v1202_v54 = vld [vmem:[%s3066_s6 + $0x60] sm:$0xff] }
  0xee   :  { %1764 = vmatprep.subr.mxu0 %v535_v56  ;;  %787 = vmatprep.mubr.f32.mxu0 %v452_v53  ;;  %v1250_v53 = vld [vmem:[%s3066_s6 + $0x1e0] sm:$0xff]  ;;  %v1217_v56 = vld [vmem:[%s3066_s6 + $0xd8] sm:$0xff] }
  0xef   :  { %1799 = vmatprep.subr.mxu1 %v567_v59  ;;  %1765 = vmatpush3.msra.mxu0 %v519_v60  ;;  %v1234_v55 = vld [vmem:[%s3066_s6 + $0x160] sm:$0xff]  ;;  %v1201_v59 = vld [vmem:[%s3066_s6 + $0x58] sm:$0xff] }
  0xf0   :  { %1800 = vmatpush3.msra.mxu1 %v551_v62  ;;  %857 = vmatprep.mubr.f32.mxu1 %v454_v58  ;;  %v1249_v58 = vld [vmem:[%s3066_s6 + $0x1d8] sm:$0xff]  ;;  %v1248_v62 = vld [vmem:[%s3066_s6 + $0x1d0] sm:$0xff] }
  0xf1   :  { %788 = vmatmul.mubr.f32.vlgmr.msra.gmra.mxu0 %v451_v63  ;;  %858 = vmatmul.mubr.f32.vlgmr.msra.gmra.mxu1 %v453_v61  ;;  %v1233_v60 = vld [vmem:[%s3066_s6 + $0x158] sm:$0xff]  ;;  %v1216_v61 = vld [vmem:[%s3066_s6 + $0xd0] sm:$0xff] }
  0xf2   :  { %922 = vmatprep.subr.mxu0 %v888_v0  ;;  %993 = vmatprep.subr.mxu1 %v890_v1  ;;  %v1200_v63 = vld [vmem:[%s3066_s6 + $0x50] sm:$0xff]  ;;  %v1215_v1 = vld [vmem:[%s3066_s6 + $0xc8] sm:$0xff] }
  0xf3   :  { %923 = vmatpush1.msra.mxu0 %v887_v2  ;;  %994 = vmatpush1.msra.mxu1 %v889_v3  ;;  %v1232_v0 = vld [vmem:[%s3066_s6 + $0x150] sm:$0xff]  ;;  %v1247_v2 = vld [vmem:[%s3066_s6 + $0x1c8] sm:$0xff] }
  0xf4   :  { %924 = vmatprep.subr.mxu0 %v880_v4  ;;  %995 = vmatprep.subr.mxu1 %v882_v5  ;;  %v1199_v3 = vld [vmem:[%s3066_s6 + $0x48] sm:$0xff]  ;;  %v1214_v5 = vld [vmem:[%s3066_s6 + $0xc0] sm:$0xff] }
  0xf5   :  { %925 = vmatpush1.msra.mxu0 %v879_v7  ;;  %996 = vmatpush1.msra.mxu1 %v881_v8  ;;  %v1231_v4 = vld [vmem:[%s3066_s6 + $0x148] sm:$0xff]  ;;  %v1246_v7 = vld [vmem:[%s3066_s6 + $0x1c0] sm:$0xff] }
  0xf6   :  { %926 = vmatprep.subr.mxu0 %v872_v9  ;;  %997 = vmatprep.subr.mxu1 %v874_v10  ;;  %v1198_v8 = vld [vmem:[%s3066_s6 + $0x40] sm:$0xff]  ;;  %v1213_v10 = vld [vmem:[%s3066_s6 + $0xb8] sm:$0xff] }
  0xf7   :  { %927 = vmatpush1.msra.mxu0 %v871_v11  ;;  %998 = vmatpush1.msra.mxu1 %v873_v12  ;;  %v1230_v9 = vld [vmem:[%s3066_s6 + $0x140] sm:$0xff]  ;;  %v1245_v11 = vld [vmem:[%s3066_s6 + $0x1b8] sm:$0xff] }
  0xf8   :  { %928 = vmatprep.subr.mxu0 %v864_v13  ;;  %999 = vmatprep.subr.mxu1 %v866_v14  ;;  %v1197_v12 = vld [vmem:[%s3066_s6 + $0x38] sm:$0xff]  ;;  %v1212_v14 = vld [vmem:[%s3066_s6 + $0xb0] sm:$0xff] }
  0xf9   :  { %929 = vmatpush1.msra.mxu0 %v863_v15  ;;  %962 = vmatprep.mubr.f32.mxu0 %v1959_v6  ;;  %v1229_v13 = vld [vmem:[%s3066_s6 + $0x138] sm:$0xff]  ;;  %v1244_v15 = vld [vmem:[%s3066_s6 + $0x1b0] sm:$0xff] }
  0xfa   :  { %1000 = vmatpush1.msra.mxu1 %v865_v16  ;;  %1033 = vmatprep.mubr.f32.mxu1 %v1959_v6  ;;  %v1196_v16 = vld [vmem:[%s3066_s6 + $0x30] sm:$0xff] }
  0xfb   :  { %1660 = vmatmul.mubr.msk.f32.vlgmr.msra.gmra.mxu0 %vm115_vm0, %v2593_v17  ;;  %1661 = vmatmul.mubr.msk.f32.vlgmr.msra.gmra.mxu1 %vm115_vm0, %v2593_v17 }
  0xfc   :  { %1064 = vmatprep.subr.mxu0 %v892_v18  ;;  %1135 = vmatprep.subr.mxu1 %v894_v19  ;;  %v1228_v18 = vld [vmem:[%s3066_s6 + $0x130] sm:$0xff]  ;;  %v1211_v19 = vld [vmem:[%s3066_s6 + $0xa8] sm:$0xff] }
  0xfd   :  { %1065 = vmatpush1.msra.mxu0 %v891_v20  ;;  %1136 = vmatpush1.msra.mxu1 %v893_v21  ;;  %v1243_v20 = vld [vmem:[%s3066_s6 + $0x1a8] sm:$0xff] }
  0xfe   :  { %1066 = vmatprep.subr.mxu0 %v884_v22  ;;  %1137 = vmatprep.subr.mxu1 %v886_v23  ;;  %v1195_v21 = vld [vmem:[%s3066_s6 + $0x28] sm:$0xff]  ;;  %v1210_v23 = vld [vmem:[%s3066_s6 + $0xa0] sm:$0xff] }
  0xff   :  { %1067 = vmatpush1.msra.mxu0 %v883_v24  ;;  %1138 = vmatpush1.msra.mxu1 %v885_v25  ;;  %v1227_v22 = vld [vmem:[%s3066_s6 + $0x128] sm:$0xff]  ;;  %v1242_v24 = vld [vmem:[%s3066_s6 + $0x1a0] sm:$0xff] }
 0x100   :  { %1068 = vmatprep.subr.mxu0 %v876_v26  ;;  %1139 = vmatprep.subr.mxu1 %v878_v27  ;;  %v1194_v25 = vld [vmem:[%s3066_s6 + $0x20] sm:$0xff]  ;;  %v1209_v27 = vld [vmem:[%s3066_s6 + $0x98] sm:$0xff] }
 0x101   :  { %1069 = vmatpush1.msra.mxu0 %v875_v28  ;;  %1104 = vmatprep.mubr.f32.mxu0 %v1959_v6  ;;  %v1226_v26 = vld [vmem:[%s3066_s6 + $0x120] sm:$0xff]  ;;  %v1241_v28 = vld [vmem:[%s3066_s6 + $0x198] sm:$0xff] }
 0x102   :  { %1070 = vmatprep.subr.mxu0 %v868_v29  ;;  %1140 = vmatpush1.msra.mxu1 %v877_v30  ;;  %v1193_v29 = vld [vmem:[%s3066_s6 + $0x18] sm:$0xff] }
 0x103   :  { %1071 = vmatpush1.msra.mxu0 %v867_v31  ;;  %1141 = vmatprep.subr.mxu1 %v870_v32  ;;  %v1225_v30 = vld [vmem:[%s3066_s6 + $0x118] sm:$0xff]  ;;  %v1208_v31 = vld [vmem:[%s3066_s6 + $0x90] sm:$0xff] }
 0x104   :  { %1662 = vmatmul.mubr.msk.f32.vlgmr.msra.gmra.mxu0 %vm115_vm0, %v2593_v17  ;;  %1142 = vmatpush1.msra.mxu1 %v869_v33  ;;  %v1240_v32 = vld [vmem:[%s3066_s6 + $0x190] sm:$0xff] }
 0x105   :  { %1175 = vmatprep.mubr.f32.mxu1 %v1959_v6  ;;  %1804 = vmatprep.subr.mxu0 %v1221_v34  ;;  %v1237_v6 = vld [vmem:[%s3066_s6 + $0x178] sm:$0xff]  ;;  %v1192_v33 = vld [vmem:[%s3066_s6 + $0x10] sm:$0xff] }
 0x106   :  { %1663 = vmatmul.mubr.msk.f32.vlgmr.msra.gmra.mxu1 %vm115_vm0, %v2593_v17  ;;  %1839 = vmatprep.subr.mxu1 %v1253_v35  ;;  %v1224_v34 = vld [vmem:[%s3066_s6 + $0x110] sm:$0xff]  ;;  %v1207_v35 = vld [vmem:[%s3066_s6 + $0x88] sm:$0xff] }
 0x107   :  { %1805 = vmatpush3.msra.mxu0 %v1205_v36  ;;  %1840 = vmatpush3.msra.mxu1 %v1237_v6  ;;  %v1239_v36 = vld [vmem:[%s3066_s6 + $0x188] sm:$0xff] }
 0x108   :  { %1806 = vmatprep.subr.mxu0 %v1220_v38  ;;  %1841 = vmatprep.subr.mxu1 %v1252_v39  ;;  %v1191_v6 = vld [vmem:[%s3066_s6 + $0x8] sm:$0xff]  ;;  %v1206_v39 = vld [vmem:[%s3066_s6 + $0x80] sm:$0xff] }
 0x109   :  { %1807 = vmatpush3.msra.mxu0 %v1204_v43  ;;  %1842 = vmatpush3.msra.mxu1 %v1236_v45  ;;  %v1223_v38 = vld [vmem:[%s3066_s6 + $0x108] sm:$0xff]  ;;  %v1238_v43 = vld [vmem:[%s3066_s6 + $0x180] sm:$0xff] }
 0x10a   :  { %1808 = vmatprep.subr.mxu0 %v1219_v46  ;;  %1843 = vmatprep.subr.mxu1 %v1251_v47  ;;  %v1190_v45 = vld [vmem:[%s3066_s6] sm:$0xff]  ;;  %v1285_v47 = vld [vmem:[%s3066_s6 + $0x2f8] sm:$0xff] }
 0x10b   :  { %1809 = vmatpush3.msra.mxu0 %v1203_v49  ;;  %1844 = vmatpush3.msra.mxu1 %v1235_v50  ;;  %v1222_v46 = vld [vmem:[%s3066_s6 + $0x100] sm:$0xff]  ;;  %v1317_v49 = vld [vmem:[%s3066_s6 + $0x3f8] sm:$0xff] }
 0x10c   :  { %1810 = vmatprep.subr.mxu0 %v1218_v51  ;;  %1845 = vmatprep.subr.mxu1 %v1250_v53 }
 0x10d   :  { %1811 = vmatpush3.msra.mxu0 %v1202_v54  ;;  %1846 = vmatpush3.msra.mxu1 %v1234_v55 }
 0x10e   :  { %1812 = vmatprep.subr.mxu0 %v1217_v56  ;;  %1847 = vmatprep.subr.mxu1 %v1249_v58 }
 0x10f   :  { %1813 = vmatpush3.msra.mxu0 %v1201_v59  ;;  %1848 = vmatpush3.msra.mxu1 %v1233_v60  ;;  %v1948_v59 = vld [vmem:[%s3060_s0] sm:$0xff] }
 0x110   :  { %1814 = vmatprep.subr.mxu0 %v1216_v61  ;;  %1849 = vmatprep.subr.mxu1 %v1248_v62  ;;  %v1598_v60 = vmul.f32 %v1948_v59, %v1948_v59  ;;  %v1599_v61 = vmul.f32 %v2593_v17, %v2593_v17  ;;  %v1292_v59 = vld [vmem:[%s3066_s6 + $0x330] sm:$0xff] }
 0x111   :  { %1815 = vmatpush3.msra.mxu0 %v1200_v63  ;;  %1850 = vmatpush3.msra.mxu1 %v1232_v0 }
 0x112   :  { %1816 = vmatprep.subr.mxu0 %v1215_v1  ;;  %1851 = vmatprep.subr.mxu1 %v1247_v2 }
 0x113   :  { %1817 = vmatpush3.msra.mxu0 %v1199_v3  ;;  %1852 = vmatpush3.msra.mxu1 %v1231_v4  ;;  %v1600_v4 = vadd.f32 %v1599_v61, %v1598_v60  ;;  %v1275_v60 = vld [vmem:[%s3066_s6 + $0x2a8] sm:$0xff] }
 0x114   :  { %1818 = vmatprep.subr.mxu0 %v1214_v5  ;;  %1853 = vmatprep.subr.mxu1 %v1246_v7  ;;  %v1307_v61 = vld [vmem:[%s3066_s6 + $0x3a8] sm:$0xff] }
 0x115   :  { %1819 = vmatpush3.msra.mxu0 %v1198_v8  ;;  %1854 = vmatpush3.msra.mxu1 %v1230_v9  ;;  %v1601_v8 = vmul.f32 2.0, %v1600_v4  ;;  %v1290_v4 = vld [vmem:[%s3066_s6 + $0x320] sm:$0xff] }
 0x116   :  { %1820 = vmatprep.subr.mxu0 %v1213_v10  ;;  %1855 = vmatprep.subr.mxu1 %v1245_v11 }
 0x117   :  { %1821 = vmatpush3.msra.mxu0 %v1197_v12  ;;  %1856 = vmatpush3.msra.mxu1 %v1229_v13 }
 0x118   :  { %1822 = vmatprep.subr.mxu0 %v1212_v14  ;;  %1857 = vmatprep.subr.mxu1 %v1244_v15 }
 0x119   :  { %1823 = vmatpush3.msra.mxu0 %v1196_v16  ;;  %1858 = vmatpush3.msra.mxu1 %v1228_v18 }
 0x11a   :  { %1824 = vmatprep.subr.mxu0 %v1211_v19  ;;  %1859 = vmatprep.subr.mxu1 %v1243_v20  ;;  %v1269_v19 = vld [vmem:[%s3066_s6 + $0x278] sm:$0xff] }
 0x11b   :  { %1825 = vmatpush3.msra.mxu0 %v1195_v21  ;;  %1860 = vmatpush3.msra.mxu1 %v1227_v22  ;;  %v1301_v20 = vld [vmem:[%s3066_s6 + $0x378] sm:$0xff]  ;;  %v1283_v21 = vld [vmem:[%s3066_s6 + $0x2e8] sm:$0xff] }
 0x11c   :  { %1826 = vmatprep.subr.mxu0 %v1210_v23  ;;  %1861 = vmatprep.subr.mxu1 %v1242_v24  ;;  %v1315_v22 = vld [vmem:[%s3066_s6 + $0x3e8] sm:$0xff] }
 0x11d   :  { %1827 = vmatpush3.msra.mxu0 %v1194_v25  ;;  %1862 = vmatpush3.msra.mxu1 %v1226_v26  ;;  %v1267_v23 = vld [vmem:[%s3066_s6 + $0x268] sm:$0xff]  ;;  %v1282_v25 = vld [vmem:[%s3066_s6 + $0x2e0] sm:$0xff] }
 0x11e   :  { %1828 = vmatprep.subr.mxu0 %v1209_v27  ;;  %1863 = vmatprep.subr.mxu1 %v1241_v28  ;;  %v1299_v24 = vld [vmem:[%s3066_s6 + $0x368] sm:$0xff]  ;;  %v1314_v26 = vld [vmem:[%s3066_s6 + $0x3e0] sm:$0xff] }
 0x11f   :  { %1829 = vmatpush3.msra.mxu0 %v1193_v29  ;;  %1864 = vmatpush3.msra.mxu1 %v1225_v30  ;;  %v1266_v27 = vld [vmem:[%s3066_s6 + $0x260] sm:$0xff]  ;;  %v1281_v29 = vld [vmem:[%s3066_s6 + $0x2d8] sm:$0xff] }
 0x120   :  { %1830 = vmatprep.subr.mxu0 %v1208_v31  ;;  %1865 = vmatprep.subr.mxu1 %v1240_v32  ;;  %v1298_v28 = vld [vmem:[%s3066_s6 + $0x360] sm:$0xff]  ;;  %v1313_v30 = vld [vmem:[%s3066_s6 + $0x3d8] sm:$0xff] }
 0x121   :  { %1831 = vmatpush3.msra.mxu0 %v1192_v33  ;;  %1866 = vmatpush3.msra.mxu1 %v1224_v34  ;;  %v1265_v31 = vld [vmem:[%s3066_s6 + $0x258] sm:$0xff]  ;;  %v1280_v33 = vld [vmem:[%s3066_s6 + $0x2d0] sm:$0xff] }
 0x122   :  { %1832 = vmatprep.subr.mxu0 %v1207_v35  ;;  %1867 = vmatprep.subr.mxu1 %v1239_v36  ;;  %v1297_v32 = vld [vmem:[%s3066_s6 + $0x358] sm:$0xff]  ;;  %v1312_v34 = vld [vmem:[%s3066_s6 + $0x3d0] sm:$0xff] }
 0x123   :  { %1833 = vmatpush3.msra.mxu0 %v1191_v6  ;;  %1868 = vmatpush3.msra.mxu1 %v1223_v38  ;;  %v1264_v35 = vld [vmem:[%s3066_s6 + $0x250] sm:$0xff]  ;;  %v1279_v6 = vld [vmem:[%s3066_s6 + $0x2c8] sm:$0xff] }
 0x124   :  { %1834 = vmatprep.subr.mxu0 %v1206_v39  ;;  %1869 = vmatprep.subr.mxu1 %v1238_v43  ;;  %v1296_v36 = vld [vmem:[%s3066_s6 + $0x350] sm:$0xff]  ;;  %v1311_v38 = vld [vmem:[%s3066_s6 + $0x3c8] sm:$0xff] }
 0x125   :  { %1835 = vmatpush3.msra.mxu0 %v1190_v45  ;;  %1870 = vmatpush3.msra.mxu1 %v1222_v46  ;;  %v1263_v39 = vld [vmem:[%s3066_s6 + $0x248] sm:$0xff]  ;;  %v1278_v45 = vld [vmem:[%s3066_s6 + $0x2c0] sm:$0xff] }
 0x126   :  { %1874 = vmatprep.subr.mxu0 %v1285_v47  ;;  %1909 = vmatprep.subr.mxu1 %v1317_v49  ;;  %v1295_v43 = vld [vmem:[%s3066_s6 + $0x348] sm:$0xff]  ;;  %v1310_v46 = vld [vmem:[%s3066_s6 + $0x3c0] sm:$0xff] }
 0x127   :  { %v1262_v47 = vld [vmem:[%s3066_s6 + $0x240] sm:$0xff] }
 0x128   :  { %v1294_v49 = vld [vmem:[%s3066_s6 + $0x340] sm:$0xff] }
 0x190   :  { %v1696_v50 = vpop.f32.mrf.mxu0  ;;  %v1731_v51 = vpop.f32.mrf.mxu1 }
 0x192   :  { %v1697_v53 = vpop.f32.mrf.mxu0  ;;  %v1732_v54 = vpop.f32.mrf.mxu1 }
 0x193   :  { %v1698_v55 = vadd.f32 %v1697_v53, %v1696_v50  ;;  %v1733_v56 = vadd.f32 %v1732_v54, %v1731_v51  ;;  %v1277_v50 = vld [vmem:[%s3066_s6 + $0x2b8] sm:$0xff] }
 0x194   :  { %v1309_v51 = vld [vmem:[%s3066_s6 + $0x3b8] sm:$0xff] }
 0x195   :  { %v720_v58 = vadd.f32 %v1733_v56, %v1698_v55  ;;  %v1261_v53 = vld [vmem:[%s3066_s6 + $0x238] sm:$0xff]  ;;  %v1276_v55 = vld [vmem:[%s3066_s6 + $0x2b0] sm:$0xff] }
 0x196   :  { %v1293_v54 = vld [vmem:[%s3066_s6 + $0x338] sm:$0xff]  ;;  %v1308_v56 = vld [vmem:[%s3066_s6 + $0x3b0] sm:$0xff] }
 0x1b1   :  { %v1766_v62 = vpop.f32.mrf.mxu0  ;;  %v1801_v63 = vpop.f32.mrf.mxu1 }
 0x1b3   :  { %v1767_v0 = vpop.f32.mrf.mxu0  ;;  %v1802_v1 = vpop.f32.mrf.mxu1 }
 0x1b4   :  { %v1768_v2 = vadd.f32 %v1767_v0, %v1766_v62  ;;  %v1803_v3 = vadd.f32 %v1802_v1, %v1801_v63  ;;  %v1259_v62 = vld [vmem:[%s3066_s6 + $0x228] sm:$0xff]  ;;  %v1274_v1 = vld [vmem:[%s3066_s6 + $0x2a0] sm:$0xff] }
 0x1b5   :  { %v1291_v63 = vld [vmem:[%s3066_s6 + $0x328] sm:$0xff] }
 0x1b6   :  { %v790_v5 = vadd.f32 %v1768_v2, %v720_v58  ;;  %v1260_v58 = vld [vmem:[%s3066_s6 + $0x230] sm:$0xff]  ;;  %v1306_v2 = vld [vmem:[%s3066_s6 + $0x3a0] sm:$0xff] }
 0x1b8   :  { %v860_v7 = vadd.f32 %v1803_v3, %v790_v5  ;;  %v1258_v3 = vld [vmem:[%s3066_s6 + $0x220] sm:$0xff]  ;;  %v1273_v5 = vld [vmem:[%s3066_s6 + $0x298] sm:$0xff] }
 0x1ba   :  { %v1602_v9 = vmul.f32 %v860_v7, %v860_v7  ;;  %v1305_v7 = vld [vmem:[%s3066_s6 + $0x398] sm:$0xff] }
 0x1bb   :  { %v964_v10 = vpop.f32.mrf.mxu0  ;;  %v1035_v11 = vpop.f32.mrf.mxu1 }
 0x1bc   :  { %v2858_v12 = vadd.f32 %v1602_v9, %v1601_v8  ;;  %v1184_v13 = vmul.f32 %v1035_v11, %v2311_v37  ;;  %v1182_v18 = vmul.f32 %v964_v10, %v2326_v42  ;;  %v1284_v37 = vld [vmem:[%s3066_s6 + $0x2f0] sm:$0xff]  ;;  %v1257_v9 = vld [vmem:[%s3066_s6 + $0x218] sm:$0xff] }
 0x1bd   :  { %v966_v14 = vpop.f32.mrf.mxu0  ;;  %v1037_v15 = vpop.f32.mrf.mxu1  ;;  %v1300_v42 = vld [vmem:[%s3066_s6 + $0x370] sm:$0xff]  ;;  %v1289_v10 = vld [vmem:[%s3066_s6 + $0x318] sm:$0xff] }
 0x1be   :  { %v1183_v17 = vmul.f32 %v966_v14, %v2316_v40  ;;  %v1185_v16 = vmul.f32 %v1037_v15, %v2321_v41  ;;  %v1316_v40 = vld [vmem:[%s3066_s6 + $0x3f0] sm:$0xff] }
 0x1bf   :  { %v1268_v41 = vld [vmem:[%s3066_s6 + $0x270] sm:$0xff] }
 0x1c0   :  { %1382 = vmatprep.mubr.f32.mxu0 %v1183_v17  ;;  %1452 = vmatprep.mubr.f32.mxu1 %v1185_v16  ;;  %v1304_v14 = vld [vmem:[%s3066_s6 + $0x390] sm:$0xff] }
 0x1c1   :  { %1383 = vmatmul.mubr.f32.vlgmr.msra.gmra.mxu0 %v1182_v18  ;;  %1453 = vmatmul.mubr.f32.vlgmr.msra.gmra.mxu1 %v1184_v13  ;;  %v1272_v13 = vld [vmem:[%s3066_s6 + $0x290] sm:$0xff] }
 0x1c2   :  { %1875 = vmatpush3.msra.mxu0 %v1269_v19  ;;  %1910 = vmatpush3.msra.mxu1 %v1301_v20  ;;  %v1256_v15 = vld [vmem:[%s3066_s6 + $0x210] sm:$0xff]  ;;  %v1271_v19 = vld [vmem:[%s3066_s6 + $0x288] sm:$0xff] }
 0x1c3   :  { %1876 = vmatprep.subr.mxu0 %v1284_v37  ;;  %1911 = vmatprep.subr.mxu1 %v1316_v40  ;;  %v1288_v17 = vld [vmem:[%s3066_s6 + $0x310] sm:$0xff]  ;;  %v1303_v20 = vld [vmem:[%s3066_s6 + $0x388] sm:$0xff]  ;;  %v1270_v40 = vld [vmem:[%s3066_s6 + $0x280] sm:$0xff] }
 0x1c4   :  { %1877 = vmatpush3.msra.mxu0 %v1268_v41  ;;  %1912 = vmatpush3.msra.mxu1 %v1300_v42  ;;  %v1106_v0 = vpop.f32.mrf.mxu0  ;;  %v1255_v37 = vld [vmem:[%s3066_s6 + $0x208] sm:$0xff]  ;;  %v1302_v42 = vld [vmem:[%s3066_s6 + $0x380] sm:$0xff] }
 0x1c5   :  { %1878 = vmatprep.subr.mxu0 %v1283_v21  ;;  %1913 = vmatprep.subr.mxu1 %v1315_v22  ;;  %v1254_v21 = vld [vmem:[%s3066_s6 + $0x200] sm:$0xff] }
 0x1c6   :  { %1879 = vmatpush3.msra.mxu0 %v1267_v23  ;;  %1914 = vmatpush3.msra.mxu1 %v1299_v24  ;;  %v1177_v8 = vpop.f32.mrf.mxu1  ;;  %v1108_v11 = vpop.f32.mrf.mxu0  ;;  %v1286_v23 = vld [vmem:[%s3066_s6 + $0x300] sm:$0xff] }
 0x1c7   :  { %1880 = vmatprep.subr.mxu0 %v1282_v25  ;;  %1915 = vmatprep.subr.mxu1 %v1314_v26  ;;  %v1187_v16 = vmul.f32 %v1108_v11, %v2491_v44  ;;  %v1287_v44 = vld [vmem:[%s3066_s6 + $0x308] sm:$0xff]  ;;  %v1188_v22 = vmul.f32 %v1177_v8, %v2513_v52 }
 0x1c8   :  { %1881 = vmatpush3.msra.mxu0 %v1266_v27  ;;  %1916 = vmatpush3.msra.mxu1 %v1298_v28  ;;  %v1179_v18 = vpop.f32.mrf.mxu1 }
 0x1c9   :  { %1882 = vmatprep.subr.mxu0 %v1281_v29  ;;  %1917 = vmatprep.subr.mxu1 %v1313_v30  ;;  %v1189_v41 = vmul.f32 %v1179_v18, %v2502_v48  ;;  %v1186_v48 = vmul.f32 %v1106_v0, %v2528_v57 }
 0x1ca   :  { %1883 = vmatpush3.msra.mxu0 %v1265_v31  ;;  %1918 = vmatpush3.msra.mxu1 %v1297_v32 }
 0x1cb   :  { %1884 = vmatprep.subr.mxu0 %v1280_v33  ;;  %1919 = vmatprep.subr.mxu1 %v1312_v34 }
 0x1cc   :  { %1885 = vmatpush3.msra.mxu0 %v1264_v35  ;;  %1920 = vmatpush3.msra.mxu1 %v1296_v36 }
 0x1cd   :  { %1886 = vmatprep.subr.mxu0 %v1279_v6  ;;  %1921 = vmatprep.subr.mxu1 %v1311_v38  ;;  %v1606_v38 = vld [vmem:[#allocation2] sm:$0xff] }
 0x1ce   :  { %1887 = vmatpush3.msra.mxu0 %v1263_v39  ;;  %1922 = vmatpush3.msra.mxu1 %v1295_v43 }
 0x1cf   :  { %1888 = vmatprep.subr.mxu0 %v1278_v45  ;;  %1923 = vmatprep.subr.mxu1 %v1310_v46 }
 0x1d0   :  { %1889 = vmatpush3.msra.mxu0 %v1262_v47  ;;  %1924 = vmatpush3.msra.mxu1 %v1294_v49 }
 0x1d1   :  { %1890 = vmatprep.subr.mxu0 %v1277_v50  ;;  %1925 = vmatprep.subr.mxu1 %v1309_v51 }
 0x1d2   :  { %1891 = vmatpush3.msra.mxu0 %v1261_v53  ;;  %1926 = vmatpush3.msra.mxu1 %v1293_v54 }
 0x1d3   :  { %1892 = vmatprep.subr.mxu0 %v1276_v55  ;;  %1927 = vmatprep.subr.mxu1 %v1308_v56 }
 0x1d4   :  { %1893 = vmatpush3.msra.mxu0 %v1260_v58  ;;  %1928 = vmatpush3.msra.mxu1 %v1292_v59 }
 0x1d5   :  { %1894 = vmatprep.subr.mxu0 %v1275_v60  ;;  %1929 = vmatprep.subr.mxu1 %v1307_v61 }
 0x1d6   :  { %1895 = vmatpush3.msra.mxu0 %v1259_v62  ;;  %1930 = vmatpush3.msra.mxu1 %v1291_v63 }
 0x1d7   :  { %1896 = vmatprep.subr.mxu0 %v1274_v1  ;;  %1931 = vmatprep.subr.mxu1 %v1306_v2 }
 0x1d8   :  { %1897 = vmatpush3.msra.mxu0 %v1258_v3  ;;  %1932 = vmatpush3.msra.mxu1 %v1290_v4 }
 0x1d9   :  { %1898 = vmatprep.subr.mxu0 %v1273_v5  ;;  %1933 = vmatprep.subr.mxu1 %v1305_v7 }
 0x1da   :  { %1899 = vmatpush3.msra.mxu0 %v1257_v9  ;;  %1934 = vmatpush3.msra.mxu1 %v1289_v10 }
 0x1db   :  { %1900 = vmatprep.subr.mxu0 %v1272_v13  ;;  %1935 = vmatprep.subr.mxu1 %v1304_v14 }
 0x1dc   :  { %1901 = vmatpush3.msra.mxu0 %v1256_v15  ;;  %1936 = vmatpush3.msra.mxu1 %v1288_v17 }
 0x1dd   :  { %1902 = vmatprep.subr.mxu0 %v1271_v19  ;;  %1937 = vmatprep.subr.mxu1 %v1303_v20 }
 0x1de   :  { %1903 = vmatpush3.msra.mxu0 %v1255_v37  ;;  %1522 = vmatprep.mubr.f32.mxu0 %v1187_v16 }
 0x1df   :  { %1938 = vmatpush3.msra.mxu1 %v1287_v44  ;;  %1904 = vmatprep.subr.mxu0 %v1270_v40 }
 0x1e0   :  { %1939 = vmatprep.subr.mxu1 %v1302_v42  ;;  %1905 = vmatpush3.msra.mxu0 %v1254_v21 }
 0x1e1   :  { %1940 = vmatpush3.msra.mxu1 %v1286_v23  ;;  %1592 = vmatprep.mubr.f32.mxu1 %v1189_v41 }
 0x1e2   :  { %1523 = vmatmul.mubr.f32.vlgmr.msra.gmra.mxu0 %v1186_v48  ;;  %1593 = vmatmul.mubr.f32.vlgmr.msra.gmra.mxu1 %v1188_v22 }
 0x281   :  { %v1836_v24 = vpop.f32.mrf.mxu0  ;;  %v1871_v25 = vpop.f32.mrf.mxu1 }
 0x283   :  { %v1837_v26 = vpop.f32.mrf.mxu0  ;;  %v1872_v52 = vpop.f32.mrf.mxu1 }
 0x284   :  { %v1838_v27 = vadd.f32 %v1837_v26, %v1836_v24  ;;  %v1873_v28 = vadd.f32 %v1872_v52, %v1871_v25 }
 0x286   :  { %v1455_v33 = vadd.f32 %v1873_v28, %v1838_v27 }
 0x2a2   :  { %v1906_v29 = vpop.f32.mrf.mxu0  ;;  %v1941_v30 = vpop.f32.mrf.mxu1 }
 0x2a4   :  { %v1907_v31 = vpop.f32.mrf.mxu0  ;;  %v1942_v32 = vpop.f32.mrf.mxu1 }
 0x2a5   :  { %v1908_v34 = vadd.f32 %v1907_v31, %v1906_v29  ;;  %v1943_v57 = vadd.f32 %v1942_v32, %v1941_v30 }
 0x2a7   :  { %v1525_v35 = vadd.f32 %v1908_v34, %v1455_v33 }
 0x2a9   :  { %v1595_v36 = vadd.f32 %v1943_v57, %v1525_v35 }
 0x2ab   :  { %v1604_v6 = vmul.f32 %v1595_v36, %v1595_v36 }
 0x2ad   :  { %v1605_v39 = vadd.f32 %v1604_v6, %v2858_v12 }
 0x2af   :  { %v1607_v43 = vadd.f32 %v1606_v38, %v1605_v39 }
 0x2b1   :  { %1608 = vst.msk [vmem:[#allocation2] sm:$0xff] %vm115_vm0, %v1607_v43 }
 0x2b8   :  { %v1612_v45 = vld [vmem:[#allocation2] sm:$0xff] }
 0x2b9   :  { %v1613_v46 = vsel %vm115_vm0, %v1612_v45, 0.0 }
 0x2ba   :  { %1614 = vadd.xlane.f32.xlu0 %v1613_v46 }
 0x343   :  { %v1615_v47 = vpop.xlane.xlu0 %1614 }
 0x344   :  { %v1616_v49 = vrot.slane %v1615_v47, 4 }
 0x346   :  { %v1617_v50 = vadd.f32 %v1616_v49, %v1615_v47 }
 0x348   :  { %v1618_v51 = vrot.slane %v1617_v50, 2 }
 0x34a   :  { %v1619_v53 = vadd.f32 %v1618_v51, %v1617_v50 }
 0x34c   :  { %v1620_v54 = vrot.slane %v1619_v53, 1 }
 0x34e   :  { %v1621_v55 = vadd.f32 %v1620_v54, %v1619_v53 }
 0x350   :  { %1944 = vpush %v1621_v55 }
 0x381   :  { %s1945_s6 = spop %1944 }
 0x382   :  { %1624 = sst [smem:[#allocation3]] %s1945_s6 }
 0x383   :  { %1632 = dma.smem_to_hbm %s1960_s2, 16, %s3067_s7, [#allocation4]  }
 0x384   :  { %1957 = dma.done.wait [#allocation4], 16  }
 0x385   :  { %1958 = vsyncadd [#allocation4], 4294967280 }
 0x386   :  { %1636 = sfence }
 0x387   :  { %1637 = vsyncpa [#allocation4], 1 }

</bundles_post_ra>
